<compile_context>
chip_gen: v6e
topology: v6e:2x2x1
jax: 0.10.0
libtpu: 0.0.40
codegen_flags: <defaults>
</compile_context>

<pallas_src>
import jax
import jax.numpy as jnp
import numpy as np
from jax.experimental import pallas as pl
from jax.experimental.pallas import tpu as pltpu

EPS = 1e-5
OUT_DIM = 3                 # conv1 out channels (module default out_dim=3)
LANES = 128
STATS_CHUNK = 256           # rows per accumulation step in the stats loops
APPLY_CHUNK = 512           # rows per store step in the fused apply loop
TARGET_TILE_ROWS = 4096     # streaming tile height (2 MiB per plane buffer)
FUSED_MAX_ROWS = 4096       # planes+output <= ~16 MiB double-buffered worst case
VMEM_LIMIT_BYTES = 32 * 1024 * 1024
STATS_PAD_ROWS = 16         # 9 stat rows padded to a sublane-friendly 16


def _cdiv(a, b):
    return -(-a // b)


def _round_up(a, b):
    return _cdiv(a, b) * b


# ----------------------------------------------------------------------------
# Shared in-kernel helpers.
# ----------------------------------------------------------------------------
def _nine_sums(x, m, b):
    def s(v):
        return jnp.sum(v, axis=0, keepdims=True)
    return (s(x), s(m), s(b),
            s(x * x), s(x * m), s(x * b),
            s(m * m), s(m * b), s(b * b))


def _load_chunk(x_ref, m_ref, b_ref, start, csize, row0, valid_rows, need_mask):
    x = x_ref[pl.ds(start, csize), :]
    m = m_ref[pl.ds(start, csize), :]
    b = b_ref[pl.ds(start, csize), :]
    if need_mask:
        # Only the last (out-of-bounds) tile of the streaming grid needs this.
        ridx = jax.lax.broadcasted_iota(jnp.int32, (csize, LANES), 0) + (row0 + start)
        keep = ridx < valid_rows
        x = jnp.where(keep, x, 0.0)
        m = jnp.where(keep, m, 0.0)
        b = jnp.where(keep, b, 0.0)
    return x, m, b


def _plane_stats(x_ref, m_ref, b_ref, n_rows, *, row0=0, valid_rows=0,
                 need_mask=False, chunk=STATS_CHUNK):
    """Nine (1, 128) lane-partial sums over rows [0, n_rows) of the refs.

    Accumulates in `chunk`-row pieces with a fori_loop so vreg live ranges
    stay bounded (no spill traffic competing with the HBM-bound DMA)."""
    num_main = n_rows // chunk
    rem = n_rows - num_main * chunk
    acc = tuple(jnp.zeros((1, LANES), jnp.float32) for _ in range(9))

    def add(carry, start, csize):
        x, m, b = _load_chunk(x_ref, m_ref, b_ref, start, csize,
                              row0, valid_rows, need_mask)
        return tuple(a + p for a, p in zip(carry, _nine_sums(x, m, b)))

    if num_main > 0:
        def body(ci, carry):
            start = pl.multiple_of(ci * chunk, chunk)
            return add(carry, start, chunk)
        acc = jax.lax.fori_loop(0, num_main, body, acc, unroll=4)
    if rem > 0:
        acc = add(acc, num_main * chunk, rem)
    return acc


def _coefficients_in_kernel(tot, w1_ref, w2_ref, inv_m, out_dim):
    """Fold conv1 -> bn1 -> conv2 -> bn2 into (s0, s1, s2, t).

    tot: nine (1,1) totals [Sx,Sm,Sb,Sxx,Sxm,Sxb,Smm,Smb,Sbb].
    All arithmetic stays on (1,1) vectors (vector-scalar ops + EUP rsqrt);
    w1/w2 entries are read as scalars from SMEM."""
    mu = [tot[c] * inv_m for c in range(3)]
    second = {(0, 0): 3, (0, 1): 4, (0, 2): 5, (1, 1): 6, (1, 2): 7, (2, 2): 8}
    # TODO(synk): E[xy]-E[x]E[y] loses precision for huge M with large channel
    # offsets; switch to shifted moments if that regime ever matters.
    cov = [[None] * 3 for _ in range(3)]
    for c in range(3):
        for d in range(3):
            k = second[(c, d)] if c <= d else second[(d, c)]
            cov[c][d] = tot[k] * inv_m - mu[c] * mu[d]
    # bn1: per-output-channel inverse std of conv1 outputs.
    inv_std1 = []
    for o in range(out_dim):
        v = jnp.zeros((1, 1), jnp.float32)
        for c in range(3):
            for d in range(3):
                v = v + (cov[c][d] * w1_ref[o, c]) * w1_ref[o, d]
        inv_std1.append(jax.lax.rsqrt(v + EPS))
    # conv2 fused through bn1.
    g = []
    for c in range(3):
        acc = jnp.zeros((1, 1), jnp.float32)
        for o in range(out_dim):
            acc = acc + (inv_std1[o] * w2_ref[o]) * w1_ref[o, c]
        g.append(acc)
    # bn2 variance of the fused channel.
    v2 = jnp.zeros((1, 1), jnp.float32)
    for c in range(3):
        for d in range(3):
            v2 = v2 + (g[c] * g[d]) * cov[c][d]
    inv_std2 = jax.lax.rsqrt(v2 + EPS)
    s = [g[c] * inv_std2 for c in range(3)]
    t = -(s[0] * mu[0] + s[1] * mu[1] + s[2] * mu[2])
    # Collapse the (1,1) coefficients to rank-0 scalars for the apply phase.
    return (jnp.sum(s[0]), jnp.sum(s[1]), jnp.sum(s[2]), jnp.sum(t))


# ----------------------------------------------------------------------------
# Fused single-call path (planes resident in VMEM, read from HBM once).
# ----------------------------------------------------------------------------
def _make_fused_kernel(rows, inv_m, out_dim):
    def kernel(w1_ref, w2_ref, x_ref, m_ref, b_ref, o_ref):
        # Phase 1: nine lane-partial sums, then lane totals -> (1,1) each.
        acc = _plane_stats(x_ref, m_ref, b_ref, rows)
        tot = [jnp.sum(r, axis=1, keepdims=True) for r in acc]
        s0, s1, s2, t = _coefficients_in_kernel(tot, w1_ref, w2_ref,
                                                inv_m, out_dim)

        # Phase 2 (still on-chip): out = s0*x + s1*m + s2*b + t, chunked to
        # bound live ranges / code size.
        def store_chunk(start, csize):
            o_ref[pl.ds(start, csize), :] = (
                x_ref[pl.ds(start, csize), :] * s0
                + m_ref[pl.ds(start, csize), :] * s1
                + b_ref[pl.ds(start, csize), :] * s2 + t)

        num_main = rows // APPLY_CHUNK
        rem = rows - num_main * APPLY_CHUNK
        if num_main > 0:
            def body(ci, carry):
                store_chunk(pl.multiple_of(ci * APPLY_CHUNK, APPLY_CHUNK),
                            APPLY_CHUNK)
                return carry
            jax.lax.fori_loop(0, num_main, body, 0)
        if rem > 0:
            store_chunk(num_main * APPLY_CHUNK, rem)
    return kernel


# ----------------------------------------------------------------------------
# Streaming two-pass path (large inputs).
# ----------------------------------------------------------------------------
def _make_stats_kernel(tile_rows, total_rows, need_mask):
    def kernel(x_ref, m_ref, b_ref, o_ref):
        row0 = pl.program_id(0) * tile_rows
        acc = _plane_stats(x_ref, m_ref, b_ref, tile_rows, row0=row0,
                           valid_rows=total_rows, need_mask=need_mask)
        # Direct per-row stores (no concatenate / sublane repack).
        for k, row in enumerate(acc):
            o_ref[pl.ds(k, 1), :] = row
        # Rows 9..15 of the block are padding and are never read back.
    return kernel


def _apply_kernel(coef_ref, x_ref, m_ref, b_ref, o_ref):
    # coef_ref: (4,) f32 in SMEM = [s0, s1, s2, t]
    o_ref[...] = (x_ref[...] * coef_ref[0] + m_ref[...] * coef_ref[1]
                  + b_ref[...] * coef_ref[2] + coef_ref[3])


# ----------------------------------------------------------------------------
# Wrapper.
# ----------------------------------------------------------------------------
@jax.jit
def filter_cnn_forward(x, mask, bias_mask, w1, b1, w2, b2):
    """x, mask, bias_mask: (B, H, W) float32.
    w1: (OUT_DIM, 3), b1: (OUT_DIM,), w2: (1, OUT_DIM), b2: (1,).
    Returns (B, 1, H, W) float32 == FilterCNN.forward with its (fresh)
    BatchNorms in training mode (batch stats, gamma=1, beta=0).  The conv
    biases b1/b2 cancel exactly through the BatchNorms."""
    del b1, b2  # mathematically cancelled by the training-mode BatchNorms
    B, H, W = x.shape
    M = B * H * W
    out_dim = w1.shape[0]

    # Lane-dense planes.  Fast path: M % 128 == 0 -> reshape is a free view,
    # no pad / no output slice (saves ~8N bytes of pure-copy HBM traffic).
    rows = _cdiv(M, LANES)
    pad = rows * LANES - M

    def to_plane(a):
        a = a.astype(jnp.float32).reshape(-1)
        if pad:
            # TODO(synk): the ragged tail could also be masked fully in-kernel
            # to avoid this pad copy; kept as a rare fallback.
            a = jnp.pad(a, (0, pad))
        return a.reshape(rows, LANES)

    xp, mp, bp = to_plane(x), to_plane(mask), to_plane(bias_mask)
    w1f = w1.astype(jnp.float32)              # (out_dim, 3)
    w2f = w2.astype(jnp.float32).reshape(-1)  # (out_dim,)
    inv_m = 1.0 / float(M)                    # static, baked into kernels

    smem_spec = pl.BlockSpec(memory_space=pltpu.MemorySpace.SMEM)

    if rows <= FUSED_MAX_ROWS:
        # ---------- fused path: one kernel, planes read from HBM once ------
        plane_spec = pl.BlockSpec((rows, LANES), lambda i: (0, 0))
        out_plane = pl.pallas_call(
            _make_fused_kernel(rows, inv_m, out_dim),
            out_shape=jax.ShapeDtypeStruct((rows, LANES), jnp.float32),
            grid=(1,),
            in_specs=[smem_spec, smem_spec, plane_spec, plane_spec, plane_spec],
            out_specs=plane_spec,
            compiler_params=pltpu.CompilerParams(
                vmem_limit_bytes=VMEM_LIMIT_BYTES),
        )(w1f, w2f, xp, mp, bp)
    else:
        # ---------- streaming two-pass path for large inputs ---------------
        num_tiles = max(2, _cdiv(rows, TARGET_TILE_ROWS))   # >=2: v7x megacore
        tile_rows = _round_up(_cdiv(rows, num_tiles), STATS_CHUNK)
        num_tiles = _cdiv(rows, tile_rows)
        need_mask = num_tiles * tile_rows != rows           # ragged last tile

        plane_spec = pl.BlockSpec((tile_rows, LANES), lambda i: (i, 0))

        # Pass 1: per-tile partial sums (OOB rows of the last tile masked).
        partials = pl.pallas_call(
            _make_stats_kernel(tile_rows, rows, need_mask),
            out_shape=jax.ShapeDtypeStruct(
                (num_tiles * STATS_PAD_ROWS, LANES), jnp.float32),
            grid=(num_tiles,),
            in_specs=[plane_spec, plane_spec, plane_spec],
            out_specs=pl.BlockSpec((STATS_PAD_ROWS, LANES), lambda i: (i, 0)),
            compiler_params=pltpu.CompilerParams(
                dimension_semantics=("parallel",),
                vmem_limit_bytes=VMEM_LIMIT_BYTES),
        )(xp, mp, bp)

        # Tiny epilogue: final reduce + 3x3 algebra on 9 scalars (negligible
        # next to the two HBM-bound passes at these sizes).
        part = partials.reshape(num_tiles, STATS_PAD_ROWS, LANES)[:, :9, :]
        sums = jnp.sum(part, axis=(0, 2))
        Mf = jnp.float32(M)
        mu = sums[:3] / Mf
        ss = jnp.stack([
            jnp.stack([sums[3], sums[4], sums[5]]),
            jnp.stack([sums[4], sums[6], sums[7]]),
            jnp.stack([sums[5], sums[7], sums[8]]),
        ])
        cov = ss / Mf - jnp.outer(mu, mu)                 # biased covariance
        var1 = jnp.einsum("oc,cd,od->o", w1f, cov, w1f)
        a1 = w1f * jax.lax.rsqrt(var1 + EPS)[:, None]
        g = w2f @ a1                                      # (3,)
        var2 = jnp.dot(g, cov @ g)
        s = g * jax.lax.rsqrt(var2 + EPS)
        t = -jnp.dot(s, mu)
        coef = jnp.concatenate([s, jnp.reshape(t, (1,))]).astype(jnp.float32)

        # Pass 2: out = s0*x + s1*m + s2*b + t.
        out_plane = pl.pallas_call(
            _apply_kernel,
            out_shape=jax.ShapeDtypeStruct((rows, LANES), jnp.float32),
            grid=(num_tiles,),
            in_specs=[smem_spec, plane_spec, plane_spec, plane_spec],
            out_specs=plane_spec,
            compiler_params=pltpu.CompilerParams(
                dimension_semantics=("parallel",),
                vmem_limit_bytes=VMEM_LIMIT_BYTES),
        )(coef, xp, mp, bp)

    if pad:
        return out_plane.reshape(-1)[:M].reshape(B, 1, H, W)
    return out_plane.reshape(B, 1, H, W)


# ----------------------------------------------------------------------------
# Pure-JAX reference mirroring the PyTorch forward (training-mode BN).
# ----------------------------------------------------------------------------
def _reference_forward(x, mask, bias_mask, w1, b1, w2, b2):
    stacked = jnp.stack([x, mask, bias_mask], axis=1)                 # (B,3,H,W)
    y1 = jnp.einsum("bchw,oc->bohw", stacked, w1) + b1[None, :, None, None]
    m1 = jnp.mean(y1, axis=(0, 2, 3), keepdims=True)
    v1 = jnp.mean((y1 - m1) ** 2, axis=(0, 2, 3), keepdims=True)
    y1n = (y1 - m1) / jnp.sqrt(v1 + EPS)
    y2 = jnp.einsum("bchw,oc->bohw", y1n, w2) + b2[None, :, None, None]
    m2 = jnp.mean(y2, axis=(0, 2, 3), keepdims=True)
    v2 = jnp.mean((y2 - m2) ** 2, axis=(0, 2, 3), keepdims=True)
    return (y2 - m2) / jnp.sqrt(v2 + EPS)


def _check(shape, key):
    k_x, k_m, k_bm, k_w1, k_b1, k_w2, k_b2 = jax.random.split(key, 7)
    B, H, W = shape
    x = jax.random.normal(k_x, (B, H, W), dtype=jnp.float32)
    mask = jax.random.normal(k_m, (B, H, W), dtype=jnp.float32)
    bias_mask = jax.random.normal(k_bm, (B, H, W), dtype=jnp.float32)
    w1 = 0.5 * jax.random.normal(k_w1, (OUT_DIM, 3), dtype=jnp.float32)
    b1 = 0.1 * jax.random.normal(k_b1, (OUT_DIM,), dtype=jnp.float32)
    w2 = 0.5 * jax.random.normal(k_w2, (1, OUT_DIM), dtype=jnp.float32)
    b2 = 0.1 * jax.random.normal(k_b2, (1,), dtype=jnp.float32)

    out = jax.block_until_ready(
        filter_cnn_forward(x, mask, bias_mask, w1, b1, w2, b2))
    ref = _reference_forward(x, mask, bias_mask, w1, b1, w2, b2)
    assert out.shape == (B, 1, H, W)
    np.testing.assert_allclose(np.asarray(out), np.asarray(ref),
                               atol=2e-3, rtol=2e-3)


if __name__ == "__main__":
    key = jax.random.PRNGKey(0)
    keys = jax.random.split(key, 4)
    _check((2, 16, 16), keys[0])    # fused path, lane-aligned (no pad/slice)
    _check((2, 15, 17), keys[1])    # fused path, ragged M -> pad fallback
    _check((2, 256, 320), keys[2])  # fused path exercising the chunk loops
    _check((2, 513, 640), keys[3])  # streaming two-pass path, ragged last tile
    print("KERNEL_OK")
</pallas_src>

<mosaic_0001>
module attributes {stable_mosaic.version = 11 : i64} {
  func.func @kernel(%arg0: i32, %arg1: memref<3x3xf32, #tpu.memory_space<smem>>, %arg2: memref<3xf32, #tpu.memory_space<smem>>, %arg3: memref<4x128xf32, #tpu.memory_space<vmem>>, %arg4: memref<4x128xf32, #tpu.memory_space<vmem>>, %arg5: memref<4x128xf32, #tpu.memory_space<vmem>>, %arg6: memref<4x128xf32, #tpu.memory_space<vmem>>) attributes {dimension_semantics = [#tpu.dimension_semantics<arbitrary>], iteration_bounds = array<i64: 1>, scalar_prefetch = 0 : i64, scratch_operands = 0 : i64, tpu.core_type = #tpu.core_type<tc>, window_params = [{transform_indices = @transform_0, window_bounds = array<i64: 3, 3>}, {transform_indices = @transform_1, window_bounds = array<i64: 3>}, {pipeline_mode = #tpu.pipeline_mode<synchronous>, transform_indices = @transform_2, window_bounds = array<i64: 4, 128>}, {pipeline_mode = #tpu.pipeline_mode<synchronous>, transform_indices = @transform_3, window_bounds = array<i64: 4, 128>}, {pipeline_mode = #tpu.pipeline_mode<synchronous>, transform_indices = @transform_4, window_bounds = array<i64: 4, 128>}, {pipeline_mode = #tpu.pipeline_mode<synchronous>, transform_indices = @transform_5, window_bounds = array<i64: 4, 128>}]} {
    %cst = arith.constant 0.000000e+00 : f32
    %0 = vector.broadcast %cst : f32 to vector<1x128xf32>
    %cst_0 = arith.constant 0.000000e+00 : f32
    %1 = vector.broadcast %cst_0 : f32 to vector<1x128xf32>
    %cst_1 = arith.constant 0.000000e+00 : f32
    %2 = vector.broadcast %cst_1 : f32 to vector<1x128xf32>
    %cst_2 = arith.constant 0.000000e+00 : f32
    %3 = vector.broadcast %cst_2 : f32 to vector<1x128xf32>
    %cst_3 = arith.constant 0.000000e+00 : f32
    %4 = vector.broadcast %cst_3 : f32 to vector<1x128xf32>
    %cst_4 = arith.constant 0.000000e+00 : f32
    %5 = vector.broadcast %cst_4 : f32 to vector<1x128xf32>
    %cst_5 = arith.constant 0.000000e+00 : f32
    %6 = vector.broadcast %cst_5 : f32 to vector<1x128xf32>
    %cst_6 = arith.constant 0.000000e+00 : f32
    %7 = vector.broadcast %cst_6 : f32 to vector<1x128xf32>
    %cst_7 = arith.constant 0.000000e+00 : f32
    %8 = vector.broadcast %cst_7 : f32 to vector<1x128xf32>
    %c0 = arith.constant 0 : index
    %c0_8 = arith.constant 0 : index
    %9 = vector.load %arg3[%c0, %c0_8] : memref<4x128xf32, #tpu.memory_space<vmem>>, vector<4x128xf32>
    %c0_9 = arith.constant 0 : index
    %c0_10 = arith.constant 0 : index
    %10 = vector.load %arg4[%c0_9, %c0_10] : memref<4x128xf32, #tpu.memory_space<vmem>>, vector<4x128xf32>
    %c0_11 = arith.constant 0 : index
    %c0_12 = arith.constant 0 : index
    %11 = vector.load %arg5[%c0_11, %c0_12] : memref<4x128xf32, #tpu.memory_space<vmem>>, vector<4x128xf32>
    %cst_13 = arith.constant dense<0.000000e+00> : vector<128xf32>
    %12 = vector.multi_reduction <add>, %9, %cst_13 [0] : vector<4x128xf32> to vector<128xf32>
    %13 = vector.shape_cast %12 : vector<128xf32> to vector<1x128xf32>
    %cst_14 = arith.constant dense<0.000000e+00> : vector<128xf32>
    %14 = vector.multi_reduction <add>, %10, %cst_14 [0] : vector<4x128xf32> to vector<128xf32>
    %15 = vector.shape_cast %14 : vector<128xf32> to vector<1x128xf32>
    %cst_15 = arith.constant dense<0.000000e+00> : vector<128xf32>
    %16 = vector.multi_reduction <add>, %11, %cst_15 [0] : vector<4x128xf32> to vector<128xf32>
    %17 = vector.shape_cast %16 : vector<128xf32> to vector<1x128xf32>
    %18 = arith.mulf %9, %9 : vector<4x128xf32>
    %cst_16 = arith.constant dense<0.000000e+00> : vector<128xf32>
    %19 = vector.multi_reduction <add>, %18, %cst_16 [0] : vector<4x128xf32> to vector<128xf32>
    %20 = vector.shape_cast %19 : vector<128xf32> to vector<1x128xf32>
    %21 = arith.mulf %9, %10 : vector<4x128xf32>
    %cst_17 = arith.constant dense<0.000000e+00> : vector<128xf32>
    %22 = vector.multi_reduction <add>, %21, %cst_17 [0] : vector<4x128xf32> to vector<128xf32>
    %23 = vector.shape_cast %22 : vector<128xf32> to vector<1x128xf32>
    %24 = arith.mulf %9, %11 : vector<4x128xf32>
    %cst_18 = arith.constant dense<0.000000e+00> : vector<128xf32>
    %25 = vector.multi_reduction <add>, %24, %cst_18 [0] : vector<4x128xf32> to vector<128xf32>
    %26 = vector.shape_cast %25 : vector<128xf32> to vector<1x128xf32>
    %27 = arith.mulf %10, %10 : vector<4x128xf32>
    %cst_19 = arith.constant dense<0.000000e+00> : vector<128xf32>
    %28 = vector.multi_reduction <add>, %27, %cst_19 [0] : vector<4x128xf32> to vector<128xf32>
    %29 = vector.shape_cast %28 : vector<128xf32> to vector<1x128xf32>
    %30 = arith.mulf %10, %11 : vector<4x128xf32>
    %cst_20 = arith.constant dense<0.000000e+00> : vector<128xf32>
    %31 = vector.multi_reduction <add>, %30, %cst_20 [0] : vector<4x128xf32> to vector<128xf32>
    %32 = vector.shape_cast %31 : vector<128xf32> to vector<1x128xf32>
    %33 = arith.mulf %11, %11 : vector<4x128xf32>
    %cst_21 = arith.constant dense<0.000000e+00> : vector<128xf32>
    %34 = vector.multi_reduction <add>, %33, %cst_21 [0] : vector<4x128xf32> to vector<128xf32>
    %35 = vector.shape_cast %34 : vector<128xf32> to vector<1x128xf32>
    %36 = arith.addf %0, %13 : vector<1x128xf32>
    %37 = arith.addf %1, %15 : vector<1x128xf32>
    %38 = arith.addf %2, %17 : vector<1x128xf32>
    %39 = arith.addf %3, %20 : vector<1x128xf32>
    %40 = arith.addf %4, %23 : vector<1x128xf32>
    %41 = arith.addf %5, %26 : vector<1x128xf32>
    %42 = arith.addf %6, %29 : vector<1x128xf32>
    %43 = arith.addf %7, %32 : vector<1x128xf32>
    %44 = arith.addf %8, %35 : vector<1x128xf32>
    %cst_22 = arith.constant dense<0.000000e+00> : vector<1xf32>
    %45 = vector.multi_reduction <add>, %36, %cst_22 [1] : vector<1x128xf32> to vector<1xf32>
    %46 = vector.shape_cast %45 : vector<1xf32> to vector<1x1xf32>
    %cst_23 = arith.constant dense<0.000000e+00> : vector<1xf32>
    %47 = vector.multi_reduction <add>, %37, %cst_23 [1] : vector<1x128xf32> to vector<1xf32>
    %48 = vector.shape_cast %47 : vector<1xf32> to vector<1x1xf32>
    %cst_24 = arith.constant dense<0.000000e+00> : vector<1xf32>
    %49 = vector.multi_reduction <add>, %38, %cst_24 [1] : vector<1x128xf32> to vector<1xf32>
    %50 = vector.shape_cast %49 : vector<1xf32> to vector<1x1xf32>
    %cst_25 = arith.constant dense<0.000000e+00> : vector<1xf32>
    %51 = vector.multi_reduction <add>, %39, %cst_25 [1] : vector<1x128xf32> to vector<1xf32>
    %52 = vector.shape_cast %51 : vector<1xf32> to vector<1x1xf32>
    %cst_26 = arith.constant dense<0.000000e+00> : vector<1xf32>
    %53 = vector.multi_reduction <add>, %40, %cst_26 [1] : vector<1x128xf32> to vector<1xf32>
    %54 = vector.shape_cast %53 : vector<1xf32> to vector<1x1xf32>
    %cst_27 = arith.constant dense<0.000000e+00> : vector<1xf32>
    %55 = vector.multi_reduction <add>, %41, %cst_27 [1] : vector<1x128xf32> to vector<1xf32>
    %56 = vector.shape_cast %55 : vector<1xf32> to vector<1x1xf32>
    %cst_28 = arith.constant dense<0.000000e+00> : vector<1xf32>
    %57 = vector.multi_reduction <add>, %42, %cst_28 [1] : vector<1x128xf32> to vector<1xf32>
    %58 = vector.shape_cast %57 : vector<1xf32> to vector<1x1xf32>
    %cst_29 = arith.constant dense<0.000000e+00> : vector<1xf32>
    %59 = vector.multi_reduction <add>, %43, %cst_29 [1] : vector<1x128xf32> to vector<1xf32>
    %60 = vector.shape_cast %59 : vector<1xf32> to vector<1x1xf32>
    %cst_30 = arith.constant dense<0.000000e+00> : vector<1xf32>
    %61 = vector.multi_reduction <add>, %44, %cst_30 [1] : vector<1x128xf32> to vector<1xf32>
    %62 = vector.shape_cast %61 : vector<1xf32> to vector<1x1xf32>
    %cst_31 = arith.constant 0.001953125 : f32
    %63 = vector.broadcast %cst_31 : f32 to vector<1x1xf32>
    %64 = arith.mulf %46, %63 : vector<1x1xf32>
    %cst_32 = arith.constant 0.001953125 : f32
    %65 = vector.broadcast %cst_32 : f32 to vector<1x1xf32>
    %66 = arith.mulf %48, %65 : vector<1x1xf32>
    %cst_33 = arith.constant 0.001953125 : f32
    %67 = vector.broadcast %cst_33 : f32 to vector<1x1xf32>
    %68 = arith.mulf %50, %67 : vector<1x1xf32>
    %cst_34 = arith.constant 0.001953125 : f32
    %69 = vector.broadcast %cst_34 : f32 to vector<1x1xf32>
    %70 = arith.mulf %52, %69 : vector<1x1xf32>
    %71 = arith.mulf %64, %64 : vector<1x1xf32>
    %72 = arith.subf %70, %71 : vector<1x1xf32>
    %cst_35 = arith.constant 0.001953125 : f32
    %73 = vector.broadcast %cst_35 : f32 to vector<1x1xf32>
    %74 = arith.mulf %54, %73 : vector<1x1xf32>
    %75 = arith.mulf %64, %66 : vector<1x1xf32>
    %76 = arith.subf %74, %75 : vector<1x1xf32>
    %cst_36 = arith.constant 0.001953125 : f32
    %77 = vector.broadcast %cst_36 : f32 to vector<1x1xf32>
    %78 = arith.mulf %56, %77 : vector<1x1xf32>
    %79 = arith.mulf %64, %68 : vector<1x1xf32>
    %80 = arith.subf %78, %79 : vector<1x1xf32>
    %cst_37 = arith.constant 0.001953125 : f32
    %81 = vector.broadcast %cst_37 : f32 to vector<1x1xf32>
    %82 = arith.mulf %54, %81 : vector<1x1xf32>
    %83 = arith.mulf %66, %64 : vector<1x1xf32>
    %84 = arith.subf %82, %83 : vector<1x1xf32>
    %cst_38 = arith.constant 0.001953125 : f32
    %85 = vector.broadcast %cst_38 : f32 to vector<1x1xf32>
    %86 = arith.mulf %58, %85 : vector<1x1xf32>
    %87 = arith.mulf %66, %66 : vector<1x1xf32>
    %88 = arith.subf %86, %87 : vector<1x1xf32>
    %cst_39 = arith.constant 0.001953125 : f32
    %89 = vector.broadcast %cst_39 : f32 to vector<1x1xf32>
    %90 = arith.mulf %60, %89 : vector<1x1xf32>
    %91 = arith.mulf %66, %68 : vector<1x1xf32>
    %92 = arith.subf %90, %91 : vector<1x1xf32>
    %cst_40 = arith.constant 0.001953125 : f32
    %93 = vector.broadcast %cst_40 : f32 to vector<1x1xf32>
    %94 = arith.mulf %56, %93 : vector<1x1xf32>
    %95 = arith.mulf %68, %64 : vector<1x1xf32>
    %96 = arith.subf %94, %95 : vector<1x1xf32>
    %cst_41 = arith.constant 0.001953125 : f32
    %97 = vector.broadcast %cst_41 : f32 to vector<1x1xf32>
    %98 = arith.mulf %60, %97 : vector<1x1xf32>
    %99 = arith.mulf %68, %66 : vector<1x1xf32>
    %100 = arith.subf %98, %99 : vector<1x1xf32>
    %cst_42 = arith.constant 0.001953125 : f32
    %101 = vector.broadcast %cst_42 : f32 to vector<1x1xf32>
    %102 = arith.mulf %62, %101 : vector<1x1xf32>
    %103 = arith.mulf %68, %68 : vector<1x1xf32>
    %104 = arith.subf %102, %103 : vector<1x1xf32>
    %cst_43 = arith.constant 0.000000e+00 : f32
    %105 = vector.broadcast %cst_43 : f32 to vector<1x1xf32>
    %c0_44 = arith.constant 0 : index
    %c0_45 = arith.constant 0 : index
    %106 = memref.load %arg1[%c0_44, %c0_45] : memref<3x3xf32, #tpu.memory_space<smem>>
    %107 = vector.broadcast %106 : f32 to vector<1x1xf32>
    %108 = arith.mulf %72, %107 : vector<1x1xf32>
    %c0_46 = arith.constant 0 : index
    %c0_47 = arith.constant 0 : index
    %109 = memref.load %arg1[%c0_46, %c0_47] : memref<3x3xf32, #tpu.memory_space<smem>>
    %110 = vector.broadcast %109 : f32 to vector<1x1xf32>
    %111 = arith.mulf %108, %110 : vector<1x1xf32>
    %112 = arith.addf %105, %111 : vector<1x1xf32>
    %c0_48 = arith.constant 0 : index
    %c0_49 = arith.constant 0 : index
    %113 = memref.load %arg1[%c0_48, %c0_49] : memref<3x3xf32, #tpu.memory_space<smem>>
    %114 = vector.broadcast %113 : f32 to vector<1x1xf32>
    %115 = arith.mulf %76, %114 : vector<1x1xf32>
    %c0_50 = arith.constant 0 : index
    %c1 = arith.constant 1 : index
    %116 = memref.load %arg1[%c0_50, %c1] : memref<3x3xf32, #tpu.memory_space<smem>>
    %117 = vector.broadcast %116 : f32 to vector<1x1xf32>
    %118 = arith.mulf %115, %117 : vector<1x1xf32>
    %119 = arith.addf %112, %118 : vector<1x1xf32>
    %c0_51 = arith.constant 0 : index
    %c0_52 = arith.constant 0 : index
    %120 = memref.load %arg1[%c0_51, %c0_52] : memref<3x3xf32, #tpu.memory_space<smem>>
    %121 = vector.broadcast %120 : f32 to vector<1x1xf32>
    %122 = arith.mulf %80, %121 : vector<1x1xf32>
    %c0_53 = arith.constant 0 : index
    %c2 = arith.constant 2 : index
    %123 = memref.load %arg1[%c0_53, %c2] : memref<3x3xf32, #tpu.memory_space<smem>>
    %124 = vector.broadcast %123 : f32 to vector<1x1xf32>
    %125 = arith.mulf %122, %124 : vector<1x1xf32>
    %126 = arith.addf %119, %125 : vector<1x1xf32>
    %c0_54 = arith.constant 0 : index
    %c1_55 = arith.constant 1 : index
    %127 = memref.load %arg1[%c0_54, %c1_55] : memref<3x3xf32, #tpu.memory_space<smem>>
    %128 = vector.broadcast %127 : f32 to vector<1x1xf32>
    %129 = arith.mulf %84, %128 : vector<1x1xf32>
    %c0_56 = arith.constant 0 : index
    %c0_57 = arith.constant 0 : index
    %130 = memref.load %arg1[%c0_56, %c0_57] : memref<3x3xf32, #tpu.memory_space<smem>>
    %131 = vector.broadcast %130 : f32 to vector<1x1xf32>
    %132 = arith.mulf %129, %131 : vector<1x1xf32>
    %133 = arith.addf %126, %132 : vector<1x1xf32>
    %c0_58 = arith.constant 0 : index
    %c1_59 = arith.constant 1 : index
    %134 = memref.load %arg1[%c0_58, %c1_59] : memref<3x3xf32, #tpu.memory_space<smem>>
    %135 = vector.broadcast %134 : f32 to vector<1x1xf32>
    %136 = arith.mulf %88, %135 : vector<1x1xf32>
    %c0_60 = arith.constant 0 : index
    %c1_61 = arith.constant 1 : index
    %137 = memref.load %arg1[%c0_60, %c1_61] : memref<3x3xf32, #tpu.memory_space<smem>>
    %138 = vector.broadcast %137 : f32 to vector<1x1xf32>
    %139 = arith.mulf %136, %138 : vector<1x1xf32>
    %140 = arith.addf %133, %139 : vector<1x1xf32>
    %c0_62 = arith.constant 0 : index
    %c1_63 = arith.constant 1 : index
    %141 = memref.load %arg1[%c0_62, %c1_63] : memref<3x3xf32, #tpu.memory_space<smem>>
    %142 = vector.broadcast %141 : f32 to vector<1x1xf32>
    %143 = arith.mulf %92, %142 : vector<1x1xf32>
    %c0_64 = arith.constant 0 : index
    %c2_65 = arith.constant 2 : index
    %144 = memref.load %arg1[%c0_64, %c2_65] : memref<3x3xf32, #tpu.memory_space<smem>>
    %145 = vector.broadcast %144 : f32 to vector<1x1xf32>
    %146 = arith.mulf %143, %145 : vector<1x1xf32>
    %147 = arith.addf %140, %146 : vector<1x1xf32>
    %c0_66 = arith.constant 0 : index
    %c2_67 = arith.constant 2 : index
    %148 = memref.load %arg1[%c0_66, %c2_67] : memref<3x3xf32, #tpu.memory_space<smem>>
    %149 = vector.broadcast %148 : f32 to vector<1x1xf32>
    %150 = arith.mulf %96, %149 : vector<1x1xf32>
    %c0_68 = arith.constant 0 : index
    %c0_69 = arith.constant 0 : index
    %151 = memref.load %arg1[%c0_68, %c0_69] : memref<3x3xf32, #tpu.memory_space<smem>>
    %152 = vector.broadcast %151 : f32 to vector<1x1xf32>
    %153 = arith.mulf %150, %152 : vector<1x1xf32>
    %154 = arith.addf %147, %153 : vector<1x1xf32>
    %c0_70 = arith.constant 0 : index
    %c2_71 = arith.constant 2 : index
    %155 = memref.load %arg1[%c0_70, %c2_71] : memref<3x3xf32, #tpu.memory_space<smem>>
    %156 = vector.broadcast %155 : f32 to vector<1x1xf32>
    %157 = arith.mulf %100, %156 : vector<1x1xf32>
    %c0_72 = arith.constant 0 : index
    %c1_73 = arith.constant 1 : index
    %158 = memref.load %arg1[%c0_72, %c1_73] : memref<3x3xf32, #tpu.memory_space<smem>>
    %159 = vector.broadcast %158 : f32 to vector<1x1xf32>
    %160 = arith.mulf %157, %159 : vector<1x1xf32>
    %161 = arith.addf %154, %160 : vector<1x1xf32>
    %c0_74 = arith.constant 0 : index
    %c2_75 = arith.constant 2 : index
    %162 = memref.load %arg1[%c0_74, %c2_75] : memref<3x3xf32, #tpu.memory_space<smem>>
    %163 = vector.broadcast %162 : f32 to vector<1x1xf32>
    %164 = arith.mulf %104, %163 : vector<1x1xf32>
    %c0_76 = arith.constant 0 : index
    %c2_77 = arith.constant 2 : index
    %165 = memref.load %arg1[%c0_76, %c2_77] : memref<3x3xf32, #tpu.memory_space<smem>>
    %166 = vector.broadcast %165 : f32 to vector<1x1xf32>
    %167 = arith.mulf %164, %166 : vector<1x1xf32>
    %168 = arith.addf %161, %167 : vector<1x1xf32>
    %cst_78 = arith.constant 9.99999974E-6 : f32
    %169 = vector.broadcast %cst_78 : f32 to vector<1x1xf32>
    %170 = arith.addf %168, %169 : vector<1x1xf32>
    %171 = math.rsqrt %170 : vector<1x1xf32>
    %cst_79 = arith.constant 0.000000e+00 : f32
    %172 = vector.broadcast %cst_79 : f32 to vector<1x1xf32>
    %c1_80 = arith.constant 1 : index
    %c0_81 = arith.constant 0 : index
    %173 = memref.load %arg1[%c1_80, %c0_81] : memref<3x3xf32, #tpu.memory_space<smem>>
    %174 = vector.broadcast %173 : f32 to vector<1x1xf32>
    %175 = arith.mulf %72, %174 : vector<1x1xf32>
    %c1_82 = arith.constant 1 : index
    %c0_83 = arith.constant 0 : index
    %176 = memref.load %arg1[%c1_82, %c0_83] : memref<3x3xf32, #tpu.memory_space<smem>>
    %177 = vector.broadcast %176 : f32 to vector<1x1xf32>
    %178 = arith.mulf %175, %177 : vector<1x1xf32>
    %179 = arith.addf %172, %178 : vector<1x1xf32>
    %c1_84 = arith.constant 1 : index
    %c0_85 = arith.constant 0 : index
    %180 = memref.load %arg1[%c1_84, %c0_85] : memref<3x3xf32, #tpu.memory_space<smem>>
    %181 = vector.broadcast %180 : f32 to vector<1x1xf32>
    %182 = arith.mulf %76, %181 : vector<1x1xf32>
    %c1_86 = arith.constant 1 : index
    %c1_87 = arith.constant 1 : index
    %183 = memref.load %arg1[%c1_86, %c1_87] : memref<3x3xf32, #tpu.memory_space<smem>>
    %184 = vector.broadcast %183 : f32 to vector<1x1xf32>
    %185 = arith.mulf %182, %184 : vector<1x1xf32>
    %186 = arith.addf %179, %185 : vector<1x1xf32>
    %c1_88 = arith.constant 1 : index
    %c0_89 = arith.constant 0 : index
    %187 = memref.load %arg1[%c1_88, %c0_89] : memref<3x3xf32, #tpu.memory_space<smem>>
    %188 = vector.broadcast %187 : f32 to vector<1x1xf32>
    %189 = arith.mulf %80, %188 : vector<1x1xf32>
    %c1_90 = arith.constant 1 : index
    %c2_91 = arith.constant 2 : index
    %190 = memref.load %arg1[%c1_90, %c2_91] : memref<3x3xf32, #tpu.memory_space<smem>>
    %191 = vector.broadcast %190 : f32 to vector<1x1xf32>
    %192 = arith.mulf %189, %191 : vector<1x1xf32>
    %193 = arith.addf %186, %192 : vector<1x1xf32>
    %c1_92 = arith.constant 1 : index
    %c1_93 = arith.constant 1 : index
    %194 = memref.load %arg1[%c1_92, %c1_93] : memref<3x3xf32, #tpu.memory_space<smem>>
    %195 = vector.broadcast %194 : f32 to vector<1x1xf32>
    %196 = arith.mulf %84, %195 : vector<1x1xf32>
    %c1_94 = arith.constant 1 : index
    %c0_95 = arith.constant 0 : index
    %197 = memref.load %arg1[%c1_94, %c0_95] : memref<3x3xf32, #tpu.memory_space<smem>>
    %198 = vector.broadcast %197 : f32 to vector<1x1xf32>
    %199 = arith.mulf %196, %198 : vector<1x1xf32>
    %200 = arith.addf %193, %199 : vector<1x1xf32>
    %c1_96 = arith.constant 1 : index
    %c1_97 = arith.constant 1 : index
    %201 = memref.load %arg1[%c1_96, %c1_97] : memref<3x3xf32, #tpu.memory_space<smem>>
    %202 = vector.broadcast %201 : f32 to vector<1x1xf32>
    %203 = arith.mulf %88, %202 : vector<1x1xf32>
    %c1_98 = arith.constant 1 : index
    %c1_99 = arith.constant 1 : index
    %204 = memref.load %arg1[%c1_98, %c1_99] : memref<3x3xf32, #tpu.memory_space<smem>>
    %205 = vector.broadcast %204 : f32 to vector<1x1xf32>
    %206 = arith.mulf %203, %205 : vector<1x1xf32>
    %207 = arith.addf %200, %206 : vector<1x1xf32>
    %c1_100 = arith.constant 1 : index
    %c1_101 = arith.constant 1 : index
    %208 = memref.load %arg1[%c1_100, %c1_101] : memref<3x3xf32, #tpu.memory_space<smem>>
    %209 = vector.broadcast %208 : f32 to vector<1x1xf32>
    %210 = arith.mulf %92, %209 : vector<1x1xf32>
    %c1_102 = arith.constant 1 : index
    %c2_103 = arith.constant 2 : index
    %211 = memref.load %arg1[%c1_102, %c2_103] : memref<3x3xf32, #tpu.memory_space<smem>>
    %212 = vector.broadcast %211 : f32 to vector<1x1xf32>
    %213 = arith.mulf %210, %212 : vector<1x1xf32>
    %214 = arith.addf %207, %213 : vector<1x1xf32>
    %c1_104 = arith.constant 1 : index
    %c2_105 = arith.constant 2 : index
    %215 = memref.load %arg1[%c1_104, %c2_105] : memref<3x3xf32, #tpu.memory_space<smem>>
    %216 = vector.broadcast %215 : f32 to vector<1x1xf32>
    %217 = arith.mulf %96, %216 : vector<1x1xf32>
    %c1_106 = arith.constant 1 : index
    %c0_107 = arith.constant 0 : index
    %218 = memref.load %arg1[%c1_106, %c0_107] : memref<3x3xf32, #tpu.memory_space<smem>>
    %219 = vector.broadcast %218 : f32 to vector<1x1xf32>
    %220 = arith.mulf %217, %219 : vector<1x1xf32>
    %221 = arith.addf %214, %220 : vector<1x1xf32>
    %c1_108 = arith.constant 1 : index
    %c2_109 = arith.constant 2 : index
    %222 = memref.load %arg1[%c1_108, %c2_109] : memref<3x3xf32, #tpu.memory_space<smem>>
    %223 = vector.broadcast %222 : f32 to vector<1x1xf32>
    %224 = arith.mulf %100, %223 : vector<1x1xf32>
    %c1_110 = arith.constant 1 : index
    %c1_111 = arith.constant 1 : index
    %225 = memref.load %arg1[%c1_110, %c1_111] : memref<3x3xf32, #tpu.memory_space<smem>>
    %226 = vector.broadcast %225 : f32 to vector<1x1xf32>
    %227 = arith.mulf %224, %226 : vector<1x1xf32>
    %228 = arith.addf %221, %227 : vector<1x1xf32>
    %c1_112 = arith.constant 1 : index
    %c2_113 = arith.constant 2 : index
    %229 = memref.load %arg1[%c1_112, %c2_113] : memref<3x3xf32, #tpu.memory_space<smem>>
    %230 = vector.broadcast %229 : f32 to vector<1x1xf32>
    %231 = arith.mulf %104, %230 : vector<1x1xf32>
    %c1_114 = arith.constant 1 : index
    %c2_115 = arith.constant 2 : index
    %232 = memref.load %arg1[%c1_114, %c2_115] : memref<3x3xf32, #tpu.memory_space<smem>>
    %233 = vector.broadcast %232 : f32 to vector<1x1xf32>
    %234 = arith.mulf %231, %233 : vector<1x1xf32>
    %235 = arith.addf %228, %234 : vector<1x1xf32>
    %cst_116 = arith.constant 9.99999974E-6 : f32
    %236 = vector.broadcast %cst_116 : f32 to vector<1x1xf32>
    %237 = arith.addf %235, %236 : vector<1x1xf32>
    %238 = math.rsqrt %237 : vector<1x1xf32>
    %cst_117 = arith.constant 0.000000e+00 : f32
    %239 = vector.broadcast %cst_117 : f32 to vector<1x1xf32>
    %c2_118 = arith.constant 2 : index
    %c0_119 = arith.constant 0 : index
    %240 = memref.load %arg1[%c2_118, %c0_119] : memref<3x3xf32, #tpu.memory_space<smem>>
    %241 = vector.broadcast %240 : f32 to vector<1x1xf32>
    %242 = arith.mulf %72, %241 : vector<1x1xf32>
    %c2_120 = arith.constant 2 : index
    %c0_121 = arith.constant 0 : index
    %243 = memref.load %arg1[%c2_120, %c0_121] : memref<3x3xf32, #tpu.memory_space<smem>>
    %244 = vector.broadcast %243 : f32 to vector<1x1xf32>
    %245 = arith.mulf %242, %244 : vector<1x1xf32>
    %246 = arith.addf %239, %245 : vector<1x1xf32>
    %c2_122 = arith.constant 2 : index
    %c0_123 = arith.constant 0 : index
    %247 = memref.load %arg1[%c2_122, %c0_123] : memref<3x3xf32, #tpu.memory_space<smem>>
    %248 = vector.broadcast %247 : f32 to vector<1x1xf32>
    %249 = arith.mulf %76, %248 : vector<1x1xf32>
    %c2_124 = arith.constant 2 : index
    %c1_125 = arith.constant 1 : index
    %250 = memref.load %arg1[%c2_124, %c1_125] : memref<3x3xf32, #tpu.memory_space<smem>>
    %251 = vector.broadcast %250 : f32 to vector<1x1xf32>
    %252 = arith.mulf %249, %251 : vector<1x1xf32>
    %253 = arith.addf %246, %252 : vector<1x1xf32>
    %c2_126 = arith.constant 2 : index
    %c0_127 = arith.constant 0 : index
    %254 = memref.load %arg1[%c2_126, %c0_127] : memref<3x3xf32, #tpu.memory_space<smem>>
    %255 = vector.broadcast %254 : f32 to vector<1x1xf32>
    %256 = arith.mulf %80, %255 : vector<1x1xf32>
    %c2_128 = arith.constant 2 : index
    %c2_129 = arith.constant 2 : index
    %257 = memref.load %arg1[%c2_128, %c2_129] : memref<3x3xf32, #tpu.memory_space<smem>>
    %258 = vector.broadcast %257 : f32 to vector<1x1xf32>
    %259 = arith.mulf %256, %258 : vector<1x1xf32>
    %260 = arith.addf %253, %259 : vector<1x1xf32>
    %c2_130 = arith.constant 2 : index
    %c1_131 = arith.constant 1 : index
    %261 = memref.load %arg1[%c2_130, %c1_131] : memref<3x3xf32, #tpu.memory_space<smem>>
    %262 = vector.broadcast %261 : f32 to vector<1x1xf32>
    %263 = arith.mulf %84, %262 : vector<1x1xf32>
    %c2_132 = arith.constant 2 : index
    %c0_133 = arith.constant 0 : index
    %264 = memref.load %arg1[%c2_132, %c0_133] : memref<3x3xf32, #tpu.memory_space<smem>>
    %265 = vector.broadcast %264 : f32 to vector<1x1xf32>
    %266 = arith.mulf %263, %265 : vector<1x1xf32>
    %267 = arith.addf %260, %266 : vector<1x1xf32>
    %c2_134 = arith.constant 2 : index
    %c1_135 = arith.constant 1 : index
    %268 = memref.load %arg1[%c2_134, %c1_135] : memref<3x3xf32, #tpu.memory_space<smem>>
    %269 = vector.broadcast %268 : f32 to vector<1x1xf32>
    %270 = arith.mulf %88, %269 : vector<1x1xf32>
    %c2_136 = arith.constant 2 : index
    %c1_137 = arith.constant 1 : index
    %271 = memref.load %arg1[%c2_136, %c1_137] : memref<3x3xf32, #tpu.memory_space<smem>>
    %272 = vector.broadcast %271 : f32 to vector<1x1xf32>
    %273 = arith.mulf %270, %272 : vector<1x1xf32>
    %274 = arith.addf %267, %273 : vector<1x1xf32>
    %c2_138 = arith.constant 2 : index
    %c1_139 = arith.constant 1 : index
    %275 = memref.load %arg1[%c2_138, %c1_139] : memref<3x3xf32, #tpu.memory_space<smem>>
    %276 = vector.broadcast %275 : f32 to vector<1x1xf32>
    %277 = arith.mulf %92, %276 : vector<1x1xf32>
    %c2_140 = arith.constant 2 : index
    %c2_141 = arith.constant 2 : index
    %278 = memref.load %arg1[%c2_140, %c2_141] : memref<3x3xf32, #tpu.memory_space<smem>>
    %279 = vector.broadcast %278 : f32 to vector<1x1xf32>
    %280 = arith.mulf %277, %279 : vector<1x1xf32>
    %281 = arith.addf %274, %280 : vector<1x1xf32>
    %c2_142 = arith.constant 2 : index
    %c2_143 = arith.constant 2 : index
    %282 = memref.load %arg1[%c2_142, %c2_143] : memref<3x3xf32, #tpu.memory_space<smem>>
    %283 = vector.broadcast %282 : f32 to vector<1x1xf32>
    %284 = arith.mulf %96, %283 : vector<1x1xf32>
    %c2_144 = arith.constant 2 : index
    %c0_145 = arith.constant 0 : index
    %285 = memref.load %arg1[%c2_144, %c0_145] : memref<3x3xf32, #tpu.memory_space<smem>>
    %286 = vector.broadcast %285 : f32 to vector<1x1xf32>
    %287 = arith.mulf %284, %286 : vector<1x1xf32>
    %288 = arith.addf %281, %287 : vector<1x1xf32>
    %c2_146 = arith.constant 2 : index
    %c2_147 = arith.constant 2 : index
    %289 = memref.load %arg1[%c2_146, %c2_147] : memref<3x3xf32, #tpu.memory_space<smem>>
    %290 = vector.broadcast %289 : f32 to vector<1x1xf32>
    %291 = arith.mulf %100, %290 : vector<1x1xf32>
    %c2_148 = arith.constant 2 : index
    %c1_149 = arith.constant 1 : index
    %292 = memref.load %arg1[%c2_148, %c1_149] : memref<3x3xf32, #tpu.memory_space<smem>>
    %293 = vector.broadcast %292 : f32 to vector<1x1xf32>
    %294 = arith.mulf %291, %293 : vector<1x1xf32>
    %295 = arith.addf %288, %294 : vector<1x1xf32>
    %c2_150 = arith.constant 2 : index
    %c2_151 = arith.constant 2 : index
    %296 = memref.load %arg1[%c2_150, %c2_151] : memref<3x3xf32, #tpu.memory_space<smem>>
    %297 = vector.broadcast %296 : f32 to vector<1x1xf32>
    %298 = arith.mulf %104, %297 : vector<1x1xf32>
    %c2_152 = arith.constant 2 : index
    %c2_153 = arith.constant 2 : index
    %299 = memref.load %arg1[%c2_152, %c2_153] : memref<3x3xf32, #tpu.memory_space<smem>>
    %300 = vector.broadcast %299 : f32 to vector<1x1xf32>
    %301 = arith.mulf %298, %300 : vector<1x1xf32>
    %302 = arith.addf %295, %301 : vector<1x1xf32>
    %cst_154 = arith.constant 9.99999974E-6 : f32
    %303 = vector.broadcast %cst_154 : f32 to vector<1x1xf32>
    %304 = arith.addf %302, %303 : vector<1x1xf32>
    %305 = math.rsqrt %304 : vector<1x1xf32>
    %cst_155 = arith.constant 0.000000e+00 : f32
    %306 = vector.broadcast %cst_155 : f32 to vector<1x1xf32>
    %c0_156 = arith.constant 0 : index
    %307 = memref.load %arg2[%c0_156] : memref<3xf32, #tpu.memory_space<smem>>
    %308 = vector.broadcast %307 : f32 to vector<1x1xf32>
    %309 = arith.mulf %171, %308 : vector<1x1xf32>
    %c0_157 = arith.constant 0 : index
    %c0_158 = arith.constant 0 : index
    %310 = memref.load %arg1[%c0_157, %c0_158] : memref<3x3xf32, #tpu.memory_space<smem>>
    %311 = vector.broadcast %310 : f32 to vector<1x1xf32>
    %312 = arith.mulf %309, %311 : vector<1x1xf32>
    %313 = arith.addf %306, %312 : vector<1x1xf32>
    %c1_159 = arith.constant 1 : index
    %314 = memref.load %arg2[%c1_159] : memref<3xf32, #tpu.memory_space<smem>>
    %315 = vector.broadcast %314 : f32 to vector<1x1xf32>
    %316 = arith.mulf %238, %315 : vector<1x1xf32>
    %c1_160 = arith.constant 1 : index
    %c0_161 = arith.constant 0 : index
    %317 = memref.load %arg1[%c1_160, %c0_161] : memref<3x3xf32, #tpu.memory_space<smem>>
    %318 = vector.broadcast %317 : f32 to vector<1x1xf32>
    %319 = arith.mulf %316, %318 : vector<1x1xf32>
    %320 = arith.addf %313, %319 : vector<1x1xf32>
    %c2_162 = arith.constant 2 : index
    %321 = memref.load %arg2[%c2_162] : memref<3xf32, #tpu.memory_space<smem>>
    %322 = vector.broadcast %321 : f32 to vector<1x1xf32>
    %323 = arith.mulf %305, %322 : vector<1x1xf32>
    %c2_163 = arith.constant 2 : index
    %c0_164 = arith.constant 0 : index
    %324 = memref.load %arg1[%c2_163, %c0_164] : memref<3x3xf32, #tpu.memory_space<smem>>
    %325 = vector.broadcast %324 : f32 to vector<1x1xf32>
    %326 = arith.mulf %323, %325 : vector<1x1xf32>
    %327 = arith.addf %320, %326 : vector<1x1xf32>
    %cst_165 = arith.constant 0.000000e+00 : f32
    %328 = vector.broadcast %cst_165 : f32 to vector<1x1xf32>
    %c0_166 = arith.constant 0 : index
    %329 = memref.load %arg2[%c0_166] : memref<3xf32, #tpu.memory_space<smem>>
    %330 = vector.broadcast %329 : f32 to vector<1x1xf32>
    %331 = arith.mulf %171, %330 : vector<1x1xf32>
    %c0_167 = arith.constant 0 : index
    %c1_168 = arith.constant 1 : index
    %332 = memref.load %arg1[%c0_167, %c1_168] : memref<3x3xf32, #tpu.memory_space<smem>>
    %333 = vector.broadcast %332 : f32 to vector<1x1xf32>
    %334 = arith.mulf %331, %333 : vector<1x1xf32>
    %335 = arith.addf %328, %334 : vector<1x1xf32>
    %c1_169 = arith.constant 1 : index
    %336 = memref.load %arg2[%c1_169] : memref<3xf32, #tpu.memory_space<smem>>
    %337 = vector.broadcast %336 : f32 to vector<1x1xf32>
    %338 = arith.mulf %238, %337 : vector<1x1xf32>
    %c1_170 = arith.constant 1 : index
    %c1_171 = arith.constant 1 : index
    %339 = memref.load %arg1[%c1_170, %c1_171] : memref<3x3xf32, #tpu.memory_space<smem>>
    %340 = vector.broadcast %339 : f32 to vector<1x1xf32>
    %341 = arith.mulf %338, %340 : vector<1x1xf32>
    %342 = arith.addf %335, %341 : vector<1x1xf32>
    %c2_172 = arith.constant 2 : index
    %343 = memref.load %arg2[%c2_172] : memref<3xf32, #tpu.memory_space<smem>>
    %344 = vector.broadcast %343 : f32 to vector<1x1xf32>
    %345 = arith.mulf %305, %344 : vector<1x1xf32>
    %c2_173 = arith.constant 2 : index
    %c1_174 = arith.constant 1 : index
    %346 = memref.load %arg1[%c2_173, %c1_174] : memref<3x3xf32, #tpu.memory_space<smem>>
    %347 = vector.broadcast %346 : f32 to vector<1x1xf32>
    %348 = arith.mulf %345, %347 : vector<1x1xf32>
    %349 = arith.addf %342, %348 : vector<1x1xf32>
    %cst_175 = arith.constant 0.000000e+00 : f32
    %350 = vector.broadcast %cst_175 : f32 to vector<1x1xf32>
    %c0_176 = arith.constant 0 : index
    %351 = memref.load %arg2[%c0_176] : memref<3xf32, #tpu.memory_space<smem>>
    %352 = vector.broadcast %351 : f32 to vector<1x1xf32>
    %353 = arith.mulf %171, %352 : vector<1x1xf32>
    %c0_177 = arith.constant 0 : index
    %c2_178 = arith.constant 2 : index
    %354 = memref.load %arg1[%c0_177, %c2_178] : memref<3x3xf32, #tpu.memory_space<smem>>
    %355 = vector.broadcast %354 : f32 to vector<1x1xf32>
    %356 = arith.mulf %353, %355 : vector<1x1xf32>
    %357 = arith.addf %350, %356 : vector<1x1xf32>
    %c1_179 = arith.constant 1 : index
    %358 = memref.load %arg2[%c1_179] : memref<3xf32, #tpu.memory_space<smem>>
    %359 = vector.broadcast %358 : f32 to vector<1x1xf32>
    %360 = arith.mulf %238, %359 : vector<1x1xf32>
    %c1_180 = arith.constant 1 : index
    %c2_181 = arith.constant 2 : index
    %361 = memref.load %arg1[%c1_180, %c2_181] : memref<3x3xf32, #tpu.memory_space<smem>>
    %362 = vector.broadcast %361 : f32 to vector<1x1xf32>
    %363 = arith.mulf %360, %362 : vector<1x1xf32>
    %364 = arith.addf %357, %363 : vector<1x1xf32>
    %c2_182 = arith.constant 2 : index
    %365 = memref.load %arg2[%c2_182] : memref<3xf32, #tpu.memory_space<smem>>
    %366 = vector.broadcast %365 : f32 to vector<1x1xf32>
    %367 = arith.mulf %305, %366 : vector<1x1xf32>
    %c2_183 = arith.constant 2 : index
    %c2_184 = arith.constant 2 : index
    %368 = memref.load %arg1[%c2_183, %c2_184] : memref<3x3xf32, #tpu.memory_space<smem>>
    %369 = vector.broadcast %368 : f32 to vector<1x1xf32>
    %370 = arith.mulf %367, %369 : vector<1x1xf32>
    %371 = arith.addf %364, %370 : vector<1x1xf32>
    %cst_185 = arith.constant 0.000000e+00 : f32
    %372 = vector.broadcast %cst_185 : f32 to vector<1x1xf32>
    %373 = arith.mulf %327, %327 : vector<1x1xf32>
    %374 = arith.mulf %373, %72 : vector<1x1xf32>
    %375 = arith.addf %372, %374 : vector<1x1xf32>
    %376 = arith.mulf %327, %349 : vector<1x1xf32>
    %377 = arith.mulf %376, %76 : vector<1x1xf32>
    %378 = arith.addf %375, %377 : vector<1x1xf32>
    %379 = arith.mulf %327, %371 : vector<1x1xf32>
    %380 = arith.mulf %379, %80 : vector<1x1xf32>
    %381 = arith.addf %378, %380 : vector<1x1xf32>
    %382 = arith.mulf %349, %327 : vector<1x1xf32>
    %383 = arith.mulf %382, %84 : vector<1x1xf32>
    %384 = arith.addf %381, %383 : vector<1x1xf32>
    %385 = arith.mulf %349, %349 : vector<1x1xf32>
    %386 = arith.mulf %385, %88 : vector<1x1xf32>
    %387 = arith.addf %384, %386 : vector<1x1xf32>
    %388 = arith.mulf %349, %371 : vector<1x1xf32>
    %389 = arith.mulf %388, %92 : vector<1x1xf32>
    %390 = arith.addf %387, %389 : vector<1x1xf32>
    %391 = arith.mulf %371, %327 : vector<1x1xf32>
    %392 = arith.mulf %391, %96 : vector<1x1xf32>
    %393 = arith.addf %390, %392 : vector<1x1xf32>
    %394 = arith.mulf %371, %349 : vector<1x1xf32>
    %395 = arith.mulf %394, %100 : vector<1x1xf32>
    %396 = arith.addf %393, %395 : vector<1x1xf32>
    %397 = arith.mulf %371, %371 : vector<1x1xf32>
    %398 = arith.mulf %397, %104 : vector<1x1xf32>
    %399 = arith.addf %396, %398 : vector<1x1xf32>
    %cst_186 = arith.constant 9.99999974E-6 : f32
    %400 = vector.broadcast %cst_186 : f32 to vector<1x1xf32>
    %401 = arith.addf %399, %400 : vector<1x1xf32>
    %402 = math.rsqrt %401 : vector<1x1xf32>
    %403 = arith.mulf %327, %402 : vector<1x1xf32>
    %404 = arith.mulf %349, %402 : vector<1x1xf32>
    %405 = arith.mulf %371, %402 : vector<1x1xf32>
    %406 = arith.mulf %403, %64 : vector<1x1xf32>
    %407 = arith.mulf %404, %66 : vector<1x1xf32>
    %408 = arith.addf %406, %407 : vector<1x1xf32>
    %409 = arith.mulf %405, %68 : vector<1x1xf32>
    %410 = arith.addf %408, %409 : vector<1x1xf32>
    %cst_187 = arith.constant 0.000000e+00 : f32
    %411 = vector.broadcast %cst_187 : f32 to vector<1x1xf32>
    %412 = arith.subf %411, %410 : vector<1x1xf32>
    %413 = vector.shape_cast %403 : vector<1x1xf32> to vector<1x1x1xf32>
    %cst_188 = arith.constant dense<0.000000e+00> : vector<1xf32>
    %414 = vector.multi_reduction <add>, %413, %cst_188 [1, 2] : vector<1x1x1xf32> to vector<1xf32>
    %415 = vector.shape_cast %414 : vector<1xf32> to vector<1x1x1xf32>
    %416 = vector.extract %415[0, 0, 0] : f32 from vector<1x1x1xf32>
    %417 = vector.shape_cast %404 : vector<1x1xf32> to vector<1x1x1xf32>
    %cst_189 = arith.constant dense<0.000000e+00> : vector<1xf32>
    %418 = vector.multi_reduction <add>, %417, %cst_189 [1, 2] : vector<1x1x1xf32> to vector<1xf32>
    %419 = vector.shape_cast %418 : vector<1xf32> to vector<1x1x1xf32>
    %420 = vector.extract %419[0, 0, 0] : f32 from vector<1x1x1xf32>
    %421 = vector.shape_cast %405 : vector<1x1xf32> to vector<1x1x1xf32>
    %cst_190 = arith.constant dense<0.000000e+00> : vector<1xf32>
    %422 = vector.multi_reduction <add>, %421, %cst_190 [1, 2] : vector<1x1x1xf32> to vector<1xf32>
    %423 = vector.shape_cast %422 : vector<1xf32> to vector<1x1x1xf32>
    %424 = vector.extract %423[0, 0, 0] : f32 from vector<1x1x1xf32>
    %425 = vector.shape_cast %412 : vector<1x1xf32> to vector<1x1x1xf32>
    %cst_191 = arith.constant dense<0.000000e+00> : vector<1xf32>
    %426 = vector.multi_reduction <add>, %425, %cst_191 [1, 2] : vector<1x1x1xf32> to vector<1xf32>
    %427 = vector.shape_cast %426 : vector<1xf32> to vector<1x1x1xf32>
    %428 = vector.extract %427[0, 0, 0] : f32 from vector<1x1x1xf32>
    %c0_192 = arith.constant 0 : index
    %c0_193 = arith.constant 0 : index
    %429 = vector.load %arg3[%c0_192, %c0_193] : memref<4x128xf32, #tpu.memory_space<vmem>>, vector<4x128xf32>
    %430 = vector.broadcast %416 : f32 to vector<4x128xf32>
    %431 = arith.mulf %429, %430 : vector<4x128xf32>
    %c0_194 = arith.constant 0 : index
    %c0_195 = arith.constant 0 : index
    %432 = vector.load %arg4[%c0_194, %c0_195] : memref<4x128xf32, #tpu.memory_space<vmem>>, vector<4x128xf32>
    %433 = vector.broadcast %420 : f32 to vector<4x128xf32>
    %434 = arith.mulf %432, %433 : vector<4x128xf32>
    %435 = arith.addf %431, %434 : vector<4x128xf32>
    %c0_196 = arith.constant 0 : index
    %c0_197 = arith.constant 0 : index
    %436 = vector.load %arg5[%c0_196, %c0_197] : memref<4x128xf32, #tpu.memory_space<vmem>>, vector<4x128xf32>
    %437 = vector.broadcast %424 : f32 to vector<4x128xf32>
    %438 = arith.mulf %436, %437 : vector<4x128xf32>
    %439 = arith.addf %435, %438 : vector<4x128xf32>
    %440 = vector.broadcast %428 : f32 to vector<4x128xf32>
    %441 = arith.addf %439, %440 : vector<4x128xf32>
    %c0_198 = arith.constant 0 : index
    %c0_199 = arith.constant 0 : index
    %442 = vector.load %arg6[%c0_198, %c0_199] : memref<4x128xf32, #tpu.memory_space<vmem>>, vector<4x128xf32>
    tpu.vector_store %arg6[%c0_198, %c0_199], %441 {strides = array<i32>} : memref<4x128xf32, #tpu.memory_space<vmem>>, vector<4x128xf32>,
    return
  }
  func.func @transform_0(%arg0: i32) -> (i32, i32) {
    %c0_i32 = arith.constant 0 : i32
    %c0_i32_0 = arith.constant 0 : i32
    %c0_i32_1 = arith.constant 0 : i32
    return %c0_i32, %c0_i32_0 : i32, i32
  }
  func.func @transform_1(%arg0: i32) -> i32 {
    %c0_i32 = arith.constant 0 : i32
    %c0_i32_0 = arith.constant 0 : i32
    return %c0_i32 : i32
  }
  func.func @transform_2(%arg0: i32) -> (i32, i32) {
    %c0_i32 = arith.constant 0 : i32
    %c0_i32_0 = arith.constant 0 : i32
    %c0_i32_1 = arith.constant 0 : i32
    return %c0_i32, %c0_i32_0 : i32, i32
  }
  func.func @transform_3(%arg0: i32) -> (i32, i32) {
    %c0_i32 = arith.constant 0 : i32
    %c0_i32_0 = arith.constant 0 : i32
    %c0_i32_1 = arith.constant 0 : i32
    return %c0_i32, %c0_i32_0 : i32, i32
  }
  func.func @transform_4(%arg0: i32) -> (i32, i32) {
    %c0_i32 = arith.constant 0 : i32
    %c0_i32_0 = arith.constant 0 : i32
    %c0_i32_1 = arith.constant 0 : i32
    return %c0_i32, %c0_i32_0 : i32, i32
  }
  func.func @transform_5(%arg0: i32) -> (i32, i32) {
    %c0_i32 = arith.constant 0 : i32
    %c0_i32_0 = arith.constant 0 : i32
    %c0_i32_1 = arith.constant 0 : i32
    return %c0_i32, %c0_i32_0 : i32, i32
  }
}

</mosaic_0001>

<bundles_post_ra>
// kernel: filter_cnn_forward.1
= control target key start
LH: loop header
LB: loop body
LE: loop exit
PB: predicated region body
PF: predicated region fallthrough
CT: control target
= control target key end

     0   :  { %10 = vsyncpa [#allocation3], 0  ;;  %s641_s0 = inlined_call_operand.vmem [shape: f32[3,3], index: 0, kind: input, shape index: {}]   ;;  %s642_s1 = inlined_call_operand.vmem [shape: f32[3], index: 1, kind: input, shape index: {}]   ;;  %s643_s2 = inlined_call_operand.vmem [shape: f32[4,128], index: 2, kind: input, shape index: {}]   ;;  %s644_s3 = inlined_call_operand.vmem [shape: f32[4,128], index: 3, kind: input, shape index: {}]   ;;  %s645_s4 = inlined_call_operand.vmem [shape: f32[4,128], index: 4, kind: input, shape index: {}]   ;;  %s646_s5 = inlined_call_operand.vmem [shape: f32[4,128], index: 5, kind: output, shape index: {}]  }
   0x1   :  { %s18_s20 = sshll.u32 %s641_s0, 4  ;;  %s19_s20 = int_to_ptr.vmem [resolvable:$true] %s18_s20 }
   0x2   :  { %11 = vsyncpa [#allocation5], 0  ;;  %s28_s23 = sshll.u32 %s642_s1, 4  ;;  %s383_s24 = scalar_lea.vmem %s19_s20, 64  ;;  %s29_s23 = int_to_ptr.vmem [resolvable:$true] %s28_s23 }
   0x3   :  { %p384_p0 = scmp.ne.s32.totalorder %s19_s20, %s383_s24  ;;  %p388_p1 = scmp.lt.s32.totalorder %s19_s20, %s19_s20 }
   0x4   :  { %p389_p2 = scmp.lt.s32.totalorder %s383_s24, %s383_s24 }
   0x6   :  { %p390_p3 = por %p389_p2, %p388_p1 }
   0x8   :  { %p391_p4 = pnand %p390_p3, %p384_p0 }
   0xa   :  { %394 = shalt.err (!%p391_p4)
}
   0xb   :  { %s411_s25 = smov [#allocation2]   ;;  %s395_s26 = scalar_lea.vmem %s29_s23, 16 }
   0xc   :  { %21 = dma.vmem_to_smem %s19_s20, 64, %s411_s25, [#allocation3]  }
   0xd   :  { %p396_p5 = scmp.ne.s32.totalorder %s29_s23, %s395_s26  ;;  %p400_p6 = scmp.lt.s32.totalorder %s29_s23, %s29_s23 }
   0xe   :  { %p401_p7 = scmp.lt.s32.totalorder %s395_s26, %s395_s26 }
  0x10   :  { %p402_p8 = por %p401_p7, %p400_p6 }
  0x12   :  { %p403_p9 = pnand %p402_p8, %p396_p5 }
  0x14   :  { %406 = shalt.err (!%p403_p9)
}
  0x15   :  { %s412_s0 = smov [#allocation4]  }
  0x16   :  { %31 = dma.vmem_to_smem %s29_s23, 16, %s412_s0, [#allocation5]  }
  0x17   :  { %407 = dma.done.wait [#allocation3], 64  }
  0x18   :  { %408 = vsyncadd [#allocation3], 4294967232 }
  0x19   :  { %409 = dma.done.wait [#allocation5], 16  }
  0x1a   :  { %410 = vsyncadd [#allocation5], 4294967280 }
  0x1b   :  { %44 = sfence }
  0x1c   :  { %v452_v0 = vld [vmem:[%s645_s4] sm:$0xf]  ;;  %vm48_vm0 = vcmask 1043456   ;;  %s360_s4 = sld [smem:[#allocation2 + $0x100]] }
  0x1d   :  { %v457_v1 = vld [vmem:[%s643_s2] sm:$0xf]  ;;  %v63_v2 = vsel %vm48_vm0, %v452_v0, 0.0  ;;  %v110_v56 = vmul.f32 %v452_v0, %v452_v0  ;;  %s166_s2 = sld [smem:[#allocation2]] }
  0x1e   :  { %v49_v3 = vsel %vm48_vm0, %v457_v1, 0.0  ;;  %v70_v4 = vmul.f32 %v457_v1, %v457_v1  ;;  %v468_v5 = vld [vmem:[%s644_s3] sm:$0xf]  ;;  %v86_v6 = vmul.f32 %v452_v0, %v457_v1  ;;  %v64_v7 = vrot.slane %v63_v2, 4  ;;  %s357_s3 = sld [smem:[#allocation2 + $0x80]] }
  0x1f   :  { %v50_v8 = vrot.slane %v49_v3, 4  ;;  %v56_v9 = vsel %vm48_vm0, %v468_v5, 0.0  ;;  %v78_v10 = vmul.f32 %v468_v5, %v457_v1  ;;  %v102_v14 = vmul.f32 %v452_v0, %v468_v5  ;;  %s355_s7 = sld [smem:[#allocation2 + $0x1]] }
  0x20   :  { %v71_v11 = vsel %vm48_vm0, %v70_v4, 0.0  ;;  %v57_v12 = vrot.slane %v56_v9, 4  ;;  %v87_v13 = vsel %vm48_vm0, %v86_v6, 0.0  ;;  %v65_v15 = vadd.f32 %v64_v7, %v63_v2  ;;  %s356_s8 = sld [smem:[#allocation2 + $0x2]] }
  0x21   :  { %v51_v16 = vadd.f32 %v50_v8, %v49_v3  ;;  %v72_v17 = vrot.slane %v71_v11, 4  ;;  %v88_v18 = vrot.slane %v87_v13, 4  ;;  %v79_v20 = vsel %vm48_vm0, %v78_v10, 0.0  ;;  %s358_s9 = sld [smem:[#allocation2 + $0x81]] }
  0x22   :  { %v58_v19 = vadd.f32 %v57_v12, %v56_v9  ;;  %v103_v21 = vsel %vm48_vm0, %v102_v14, 0.0  ;;  %v94_v22 = vmul.f32 %v468_v5, %v468_v5  ;;  %v66_v23 = vrot.slane %v65_v15, 2  ;;  %s359_s10 = sld [smem:[#allocation2 + $0x82]] }
  0x23   :  { %v52_v24 = vrot.slane %v51_v16, 2  ;;  %v73_v25 = vadd.f32 %v72_v17, %v71_v11  ;;  %v89_v26 = vadd.f32 %v88_v18, %v87_v13  ;;  %v80_v28 = vrot.slane %v79_v20, 4  ;;  %s361_s11 = sld [smem:[#allocation2 + $0x101]] }
  0x24   :  { %v59_v27 = vrot.slane %v58_v19, 2  ;;  %v104_v29 = vrot.slane %v103_v21, 4  ;;  %v95_v30 = vsel %vm48_vm0, %v94_v22, 0.0  ;;  %v67_v31 = vadd.f32 %v66_v23, %v65_v15  ;;  %s362_s12 = sld [smem:[#allocation2 + $0x102]] }
  0x25   :  { %v53_v32 = vadd.f32 %v52_v24, %v51_v16  ;;  %v74_v33 = vrot.slane %v73_v25, 2  ;;  %v90_v34 = vrot.slane %v89_v26, 2  ;;  %v81_v36 = vadd.f32 %v80_v28, %v79_v20  ;;  %s271_s13 = sld [smem:[#allocation4]] }
  0x26   :  { %v60_v35 = vadd.f32 %v59_v27, %v58_v19  ;;  %v105_v37 = vadd.f32 %v104_v29, %v103_v21  ;;  %v96_v38 = vrot.slane %v95_v30, 4  ;;  %v68_v39 = vrot.slane %v67_v31, 1  ;;  %s363_s14 = sld [smem:[#allocation4 + $0x1]] }
  0x27   :  { %v54_v40 = vrot.slane %v53_v32, 1  ;;  %v75_v41 = vadd.f32 %v74_v33, %v73_v25  ;;  %v91_v42 = vadd.f32 %v90_v34, %v89_v26  ;;  %v82_v44 = vrot.slane %v81_v36, 2  ;;  %s364_s15 = sld [smem:[#allocation4 + $0x2]] }
  0x28   :  { %v61_v43 = vrot.slane %v60_v35, 1  ;;  %v106_v45 = vrot.slane %v105_v37, 2  ;;  %v97_v46 = vadd.f32 %v96_v38, %v95_v30  ;;  %v69_v47 = vadd.f32 %v68_v39, %v67_v31 }
  0x29   :  { %v55_v48 = vadd.f32 %v54_v40, %v53_v32  ;;  %v76_v49 = vrot.slane %v75_v41, 1  ;;  %v83_v51 = vadd.f32 %v82_v44, %v81_v36  ;;  %v92_v54 = vrot.slane %v91_v42, 1 }
  0x2a   :  { %v62_v50 = vadd.f32 %v61_v43, %v60_v35  ;;  %v98_v52 = vrot.slane %v97_v46, 2  ;;  %131 = vadd.xlane.f32.xlu1 %v69_v47  ;;  %v107_v55 = vadd.f32 %v106_v45, %v105_v37  ;;  %v111_v59 = vsel %vm48_vm0, %v110_v56, 0.0 }
  0x2b   :  { %127 = vadd.xlane.f32.xlu0 %v55_v48  ;;  %v77_v53 = vadd.f32 %v76_v49, %v75_v41  ;;  %v84_v57 = vrot.slane %v83_v51, 1  ;;  %v112_v60 = vrot.slane %v111_v59, 4  ;;  %v93_v61 = vadd.f32 %v92_v54, %v91_v42 }
  0x2c   :  { %v99_v58 = vadd.f32 %v98_v52, %v97_v46  ;;  %v108_v63 = vrot.slane %v107_v55, 1  ;;  %v496_v20 = vstv %s166_s2  ;;  %v500_v22 = vstv %s357_s3 }
  0x2d   :  { %v85_v62 = vadd.f32 %v84_v57, %v83_v51  ;;  %v113_v3 = vadd.f32 %v112_v60, %v111_v59  ;;  %v502_v25 = vstv %s360_s4  ;;  %v510_v31 = vstv %s355_s7 }
  0x2e   :  { %133 = vadd.xlane.f32.xlu1 %v77_v53  ;;  %v100_v2 = vrot.slane %v99_v58, 1  ;;  %v109_v6 = vadd.f32 %v108_v63, %v107_v55  ;;  %v516_v34 = vstv %s356_s8  ;;  %v518_v35 = vstv %s358_s9 }
  0x2f   :  { %129 = vadd.xlane.f32.xlu0 %v62_v50  ;;  %v114_v4 = vrot.slane %v113_v3, 2  ;;  %v522_v38 = vstv %s359_s10  ;;  %v524_v39 = vstv %s361_s11  ;;  %v526_v40 = vstv %s362_s12 }
  0x30   :  { %v101_v7 = vadd.f32 %v100_v2, %v99_v58 }
  0x31   :  { %v115_v8 = vadd.f32 %v114_v4, %v113_v3 }
  0x32   :  { %137 = vadd.xlane.f32.xlu1 %v93_v61 }
  0x33   :  { %135 = vadd.xlane.f32.xlu0 %v85_v62  ;;  %v116_v9 = vrot.slane %v115_v8, 1 }
  0x35   :  { %v117_v10 = vadd.f32 %v116_v9, %v115_v8 }
  0x36   :  { %141 = vadd.xlane.f32.xlu1 %v109_v6 }
  0x37   :  { %139 = vadd.xlane.f32.xlu0 %v101_v7 }
  0x3b   :  { %143 = vadd.xlane.f32.xlu0 %v117_v10 }
  0xb3   :  { %v132_v11 = vpop.xlane.xlu1 %131 }
  0xb4   :  { %v128_v12 = vpop.xlane.xlu0 %127  ;;  %v490_v16 = vmul.f32 0.001953125, %v132_v11 }
  0xb5   :  { %v488_v13 = vmul.f32 0.001953125, %v128_v12 }
  0xb7   :  { %v134_v14 = vpop.xlane.xlu1 %133  ;;  %v149_v18 = vmul.f32 %v488_v13, %v488_v13  ;;  %v155_v27 = vmul.f32 %v490_v16, %v488_v13 }
  0xb8   :  { %v130_v15 = vpop.xlane.xlu0 %129  ;;  %v148_v17 = vmul.f32 0.001953125, %v134_v14 }
  0xb9   :  { %v494_v19 = vmul.f32 0.001953125, %v130_v15 }
  0xba   :  { %v498_v21 = vsub.f32 %v148_v17, %v149_v18  ;;  %v164_v18 = vmul.f32 %v490_v16, %v490_v16 }
  0xbb   :  { %v138_v23 = vpop.xlane.xlu1 %137  ;;  %v152_v29 = vmul.f32 %v494_v19, %v488_v13  ;;  %v161_v43 = vmul.f32 %v490_v16, %v494_v19  ;;  %v158_v59 = vmul.f32 %v494_v19, %v494_v19 }
  0xbc   :  { %v136_v24 = vpop.xlane.xlu0 %135  ;;  %v154_v26 = vmul.f32 0.001953125, %v138_v23  ;;  %v168_v28 = vmul.f32 %v496_v20, %v498_v21  ;;  %v203_v32 = vmul.f32 %v500_v22, %v498_v21  ;;  %v238_v41 = vmul.f32 %v502_v25, %v498_v21 }
  0xbd   :  { %v151_v30 = vmul.f32 0.001953125, %v136_v24 }
  0xbe   :  { %v514_v33 = vsub.f32 %v154_v26, %v155_v27  ;;  %v169_v45 = vmul.f32 %v168_v28, %v496_v20  ;;  %v204_v49 = vmul.f32 %v203_v32, %v500_v22  ;;  %v239_v58 = vmul.f32 %v238_v41, %v502_v25 }
  0xbf   :  { %v520_v36 = vsub.f32 %v151_v30, %v152_v29  ;;  %v142_v37 = vpop.xlane.xlu1 %141 }
  0xc0   :  { %v160_v42 = vmul.f32 0.001953125, %v142_v37  ;;  %v176_v44 = vmul.f32 %v496_v20, %v514_v33  ;;  %v211_v48 = vmul.f32 %v500_v22, %v514_v33  ;;  %v246_v52 = vmul.f32 %v502_v25, %v514_v33  ;;  %v140_v57 = vpop.xlane.xlu0 %139 }
  0xc1   :  { %v171_v46 = vmul.f32 %v496_v20, %v520_v36  ;;  %v206_v47 = vmul.f32 %v500_v22, %v520_v36  ;;  %v181_v50 = vmul.f32 %v510_v31, %v520_v36  ;;  %v241_v51 = vmul.f32 %v502_v25, %v520_v36 }
  0xc2   :  { %v548_v53 = vsub.f32 %v160_v42, %v161_v43  ;;  %v216_v56 = vmul.f32 %v518_v35, %v520_v36  ;;  %v179_v60 = vmul.f32 %v516_v34, %v176_v44  ;;  %v214_v2 = vmul.f32 %v522_v38, %v211_v48 }
  0xc3   :  { %v174_v54 = vmul.f32 %v510_v31, %v171_v46  ;;  %v209_v55 = vmul.f32 %v518_v35, %v206_v47  ;;  %v244_v61 = vmul.f32 %v524_v39, %v241_v51  ;;  %v251_v3 = vmul.f32 %v524_v39, %v520_v36 }
  0xc4   :  { %v182_v4 = vmul.f32 %v181_v50, %v496_v20  ;;  %v249_v7 = vmul.f32 %v526_v40, %v246_v52  ;;  %v157_v8 = vmul.f32 0.001953125, %v140_v57  ;;  %v187_v10 = vmul.f32 %v510_v31, %v548_v53  ;;  %v144_v37 = vpop.xlane.xlu0 %143 }
  0xc5   :  { %v175_v62 = vadd.f32 %v174_v54, %v169_v45  ;;  %v210_v63 = vadd.f32 %v209_v55, %v204_v49  ;;  %v245_v6 = vadd.f32 %v244_v61, %v239_v58  ;;  %v217_v12 = vmul.f32 %v216_v56, %v500_v22 }
  0xc6   :  { %v252_v15 = vmul.f32 %v251_v3, %v502_v25  ;;  %v568_v17 = vsub.f32 %v157_v8, %v158_v59  ;;  %v222_v26 = vmul.f32 %v518_v35, %v548_v53  ;;  %v257_v27 = vmul.f32 %v524_v39, %v548_v53 }
  0xc7   :  { %v180_v9 = vadd.f32 %v179_v60, %v175_v62  ;;  %v215_v11 = vadd.f32 %v214_v2, %v210_v63  ;;  %v250_v14 = vadd.f32 %v249_v7, %v245_v6  ;;  %v188_v41 = vmul.f32 %v187_v10, %v516_v34 }
  0xc8   :  { %v184_v29 = vmul.f32 %v510_v31, %v568_v17  ;;  %v219_v30 = vmul.f32 %v518_v35, %v568_v17  ;;  %v254_v32 = vmul.f32 %v524_v39, %v568_v17  ;;  %v190_v42 = vmul.f32 %v516_v34, %v514_v33 }
  0xc9   :  { %v183_v23 = vadd.f32 %v182_v4, %v180_v9  ;;  %v218_v24 = vadd.f32 %v217_v12, %v215_v11  ;;  %v253_v28 = vadd.f32 %v252_v15, %v250_v14  ;;  %v193_v43 = vmul.f32 %v516_v34, %v548_v53 }
  0xca   :  { %v225_v44 = vmul.f32 %v522_v38, %v514_v33  ;;  %v185_v45 = vmul.f32 %v184_v29, %v510_v31  ;;  %v220_v46 = vmul.f32 %v219_v30, %v518_v35  ;;  %v255_v47 = vmul.f32 %v254_v32, %v524_v39 }
  0xcb   :  { %v260_v48 = vmul.f32 %v526_v40, %v514_v33  ;;  %v223_v49 = vmul.f32 %v222_v26, %v522_v38  ;;  %v258_v50 = vmul.f32 %v257_v27, %v526_v40  ;;  %v228_v51 = vmul.f32 %v522_v38, %v548_v53 }
  0xcc   :  { %v163_v52 = vmul.f32 0.001953125, %v144_v37  ;;  %v186_v54 = vadd.f32 %v185_v45, %v183_v23  ;;  %v221_v55 = vadd.f32 %v220_v46, %v218_v24  ;;  %v256_v56 = vadd.f32 %v255_v47, %v253_v28 }
  0xcd   :  { %v263_v57 = vmul.f32 %v526_v40, %v548_v53  ;;  %v191_v58 = vmul.f32 %v190_v42, %v496_v20  ;;  %v194_v59 = vmul.f32 %v193_v43, %v510_v31  ;;  %v226_v60 = vmul.f32 %v225_v44, %v500_v22 }
  0xce   :  { %v603_v61 = vsub.f32 %v163_v52, %v164_v18  ;;  %v189_v62 = vadd.f32 %v188_v41, %v186_v54  ;;  %v224_v63 = vadd.f32 %v223_v49, %v221_v55  ;;  %v259_v2 = vadd.f32 %v258_v50, %v256_v56 }
  0xcf   :  { %v261_v3 = vmul.f32 %v260_v48, %v502_v25  ;;  %v229_v4 = vmul.f32 %v228_v51, %v518_v35  ;;  %v264_v12 = vmul.f32 %v263_v57, %v524_v39  ;;  %v272_v41 = vstv %s271_s13 }
  0xd0   :  { %v196_v6 = vmul.f32 %v516_v34, %v603_v61  ;;  %v231_v7 = vmul.f32 %v522_v38, %v603_v61  ;;  %v266_v8 = vmul.f32 %v526_v40, %v603_v61  ;;  %v192_v9 = vadd.f32 %v191_v58, %v189_v62 }
  0xd1   :  { %v227_v10 = vadd.f32 %v226_v60, %v224_v63  ;;  %v262_v11 = vadd.f32 %v261_v3, %v259_v2  ;;  %v277_v42 = vstv %s363_s14  ;;  %v282_v44 = vstv %s364_s15 }
  0xd2   :  { %v197_v14 = vmul.f32 %v196_v6, %v516_v34  ;;  %v232_v15 = vmul.f32 %v231_v7, %v522_v38  ;;  %v195_v18 = vadd.f32 %v194_v59, %v192_v9  ;;  %v267_v26 = vmul.f32 %v266_v8, %v526_v40 }
  0xd3   :  { %v230_v23 = vadd.f32 %v229_v4, %v227_v10  ;;  %v265_v24 = vadd.f32 %v264_v12, %v262_v11 }
  0xd4   :  { %v198_v27 = vadd.f32 %v197_v14, %v195_v18 }
  0xd5   :  { %v233_v28 = vadd.f32 %v232_v15, %v230_v23  ;;  %v268_v29 = vadd.f32 %v267_v26, %v265_v24 }
  0xd6   :  { %v199_v30 = vadd.f32 1e-05, %v198_v27 }
  0xd7   :  { %v234_v32 = vadd.f32 1e-05, %v233_v28  ;;  %v269_v37 = vadd.f32 1e-05, %v268_v29 }
  0xd8   :  { %375 = vrsqrt.f32 %v199_v30 }
  0xd9   :  { %377 = vrsqrt.f32 %v234_v32 }
  0xda   :  { %379 = vrsqrt.f32 %v269_v37 }
  0xe5   :  { %v376_v43 = vpop.eup %375 }
  0xe6   :  { %v378_v45 = vpop.eup %377  ;;  %v273_v46 = vmul.f32 %v376_v43, %v272_v41 }
  0xe7   :  { %v380_v47 = vpop.eup %379  ;;  %v278_v48 = vmul.f32 %v378_v45, %v277_v42 }
  0xe8   :  { %v283_v49 = vmul.f32 %v380_v47, %v282_v44  ;;  %v292_v50 = vmul.f32 %v273_v46, %v516_v34  ;;  %v274_v51 = vmul.f32 %v273_v46, %v496_v20  ;;  %v286_v52 = vmul.f32 %v273_v46, %v510_v31 }
  0xe9   :  { %v294_v54 = vmul.f32 %v278_v48, %v522_v38  ;;  %v279_v55 = vmul.f32 %v278_v48, %v500_v22  ;;  %v288_v56 = vmul.f32 %v278_v48, %v518_v35 }
  0xea   :  { %v296_v57 = vmul.f32 %v283_v49, %v526_v40  ;;  %v284_v58 = vmul.f32 %v283_v49, %v502_v25  ;;  %v290_v63 = vmul.f32 %v283_v49, %v524_v39 }
  0xeb   :  { %v295_v59 = vadd.f32 %v294_v54, %v292_v50  ;;  %v280_v60 = vadd.f32 %v279_v55, %v274_v51  ;;  %v289_v62 = vadd.f32 %v288_v56, %v286_v52 }
  0xed   :  { %v297_v34 = vadd.f32 %v296_v57, %v295_v59  ;;  %v285_v2 = vadd.f32 %v284_v58, %v280_v60  ;;  %v291_v20 = vadd.f32 %v290_v63, %v289_v62 }
  0xef   :  { %v298_v3 = vmul.f32 %v285_v2, %v285_v2  ;;  %v301_v31 = vmul.f32 %v291_v20, %v285_v2  ;;  %v304_v4 = vmul.f32 %v297_v34, %v285_v2  ;;  %v308_v6 = vmul.f32 %v291_v20, %v291_v20 }
  0xf0   :  { %v311_v7 = vmul.f32 %v297_v34, %v291_v20  ;;  %v316_v11 = vmul.f32 %v297_v34, %v297_v34 }
  0xf1   :  { %v299_v38 = vmul.f32 %v298_v3, %v498_v21  ;;  %v302_v22 = vmul.f32 %v301_v31, %v520_v36  ;;  %v305_v40 = vmul.f32 %v304_v4, %v514_v33  ;;  %v309_v9 = vmul.f32 %v308_v6, %v568_v17 }
  0xf2   :  { %v312_v10 = vmul.f32 %v311_v7, %v548_v53  ;;  %v317_v15 = vmul.f32 %v316_v11, %v603_v61 }
  0xf3   :  { %v303_v35 = vadd.f32 %v302_v22, %v299_v38 }
  0xf5   :  { %v306_v25 = vadd.f32 %v305_v40, %v303_v35 }
  0xf7   :  { %v307_v8 = vadd.f32 %v306_v25, %v302_v22 }
  0xf9   :  { %v310_v39 = vadd.f32 %v309_v9, %v307_v8 }
  0xfb   :  { %v313_v12 = vadd.f32 %v312_v10, %v310_v39 }
  0xfd   :  { %v314_v14 = vadd.f32 %v313_v12, %v305_v40 }
  0xff   :  { %v315_v21 = vadd.f32 %v314_v14, %v312_v10 }
 0x101   :  { %v318_v18 = vadd.f32 %v317_v15, %v315_v21 }
 0x103   :  { %v319_v36 = vadd.f32 1e-05, %v318_v18 }
 0x105   :  { %381 = vrsqrt.f32 %v319_v36 }
 0x112   :  { %v382_v23 = vpop.eup %381 }
 0x113   :  { %v321_v33 = vmul.f32 %v382_v23, %v285_v2  ;;  %v322_v24 = vmul.f32 %v382_v23, %v291_v20  ;;  %v323_v26 = vmul.f32 %v382_v23, %v297_v34 }
 0x115   :  { %v324_v27 = vmul.f32 %v321_v33, %v488_v13  ;;  %365 = vpush %v321_v33  ;;  %v325_v17 = vmul.f32 %v322_v24, %v494_v19  ;;  %v327_v53 = vmul.f32 %v323_v26, %v490_v16 }
 0x116   :  { %367 = vpush %v322_v24 }
 0x117   :  { %369 = vpush %v323_v26  ;;  %v326_v28 = vadd.f32 %v325_v17, %v324_v27 }
 0x119   :  { %v328_v29 = vadd.f32 %v327_v53, %v326_v28 }
 0x11b   :  { %v329_v61 = vsub.f32 0.0, %v328_v29 }
 0x11d   :  { %371 = vpush %v329_v61 }
 0x146   :  { %s366_s16 = spop %365 }
 0x147   :  { %v338_v30 = vstv %s366_s16  ;;  %s368_s17 = spop %367 }
 0x148   :  { %v339_v32 = vmul.f32 %v338_v30, %v457_v1  ;;  %v340_v37 = vstv %s368_s17  ;;  %s370_s18 = spop %369 }
 0x149   :  { %v341_v13 = vmul.f32 %v340_v37, %v468_v5  ;;  %v343_v41 = vstv %s370_s18 }
 0x14a   :  { %v344_v19 = vmul.f32 %v343_v41, %v452_v0 }
 0x14b   :  { %v342_v42 = vadd.f32 %v341_v13, %v339_v32 }
 0x14d   :  { %v345_v16 = vadd.f32 %v344_v19, %v342_v42 }
 0x14e   :  { %s372_s19 = spop %371 }
 0x14f   :  { %v346_v43 = vstv %s372_s19 }
 0x150   :  { %v347_v44 = vadd.f32 %v346_v43, %v345_v16 }
 0x152   :  { %348 = vst [vmem:[%s646_s5] sm:$0xf] %v347_v44 }
 0x153   :  { %353 = vsyncpa [#allocation3], 1 }
 0x154   :  { %354 = vsyncpa [#allocation5], 1 }

</bundles_post_ra>
